<compile_context>
chip_gen: v7x
topology: tpu7x:2x2x1
jax: 0.10.0
libtpu: 0.0.40
codegen_flags: <defaults>
</compile_context>

<pallas_src>
import jax
import jax.numpy as jnp
from jax.experimental import pallas as pl
from jax.experimental.pallas import tpu as pltpu


# ------------------------------ small helpers ----------------------------- #

def _round_up(x, m):
    return ((x + m - 1) // m) * m


def _vmem_cap_bytes():
    try:
        return int(pltpu.get_tpu_info().vmem_capacity_bytes)
    except Exception:            # info query only; never wraps the pallas_call
        return 64 << 20          # conservative default (v7x per-core VMEM)


def _keep_mask(mask, kh, kw, stride, padding):
    """0/1 float keep mask, (B,1,oh,ow): any mask value != 0 in the receptive field."""
    m01 = jnp.any(mask != 0, axis=1, keepdims=True).astype(jnp.float32)
    win = jax.lax.reduce_window(
        m01, 0.0, jax.lax.max,
        (1, 1, kh, kw), (1, 1, stride, stride),
        [(0, 0), (0, 0), (padding, padding), (padding, padding)])
    return (win > 0).astype(jnp.float32)


# --------------------- fused conv path (stride == 1) ---------------------- #

def _fused_forward(x, mask, weight, bias, padding, compute_dtype):
    B, C_in, H, W = x.shape
    C_out, _, kh, kw = weight.shape
    cdt = jnp.dtype(compute_dtype) if compute_dtype is not None else jnp.dtype(x.dtype)
    sub = 16 if cdt.itemsize < 4 else 8                 # sublane packing multiple

    Hp, Wp = H + 2 * padding, W + 2 * padding
    oh, ow = Hp - kh + 1, Wp - kw + 1
    Lext = oh * Wp                                       # padded-width output length
    C_in_p = _round_up(C_in, sub)
    C_out_p = _round_up(C_out, sub)
    S = Hp * Wp
    S_pad = _round_up(S + kw - 1, 128)                   # room for the largest tap shift

    # Raw x padded once (channel + spatial), flattened per image: no kh*kw inflation.
    xp = jnp.pad(x, ((0, 0), (0, C_in_p - C_in),
                     (padding, padding), (padding, padding))).astype(cdt)
    xflat = xp.reshape(B, C_in_p, S)
    xflat = jnp.pad(xflat, ((0, 0), (0, 0), (0, S_pad - S)))

    keep = _keep_mask(mask, kh, kw, 1, padding)                       # (B,1,oh,ow)
    keep = jnp.pad(keep, ((0, 0), (0, 0), (0, 0), (0, Wp - ow)))      # garbage cols -> 0
    keep = keep.reshape(B, 1, Lext)

    wk = jnp.transpose(weight, (2, 3, 0, 1)).reshape(kh * kw, C_out, C_in)
    wk = jnp.pad(wk, ((0, 0), (0, C_out_p - C_out), (0, C_in_p - C_in))).astype(cdt)
    b2 = jnp.pad(bias.reshape(C_out, 1).astype(jnp.float32),
                 ((0, C_out_p - C_out), (0, 0)))

    def kernel(x_ref, keep_ref, w_ref, b_ref, o_ref):
        # x_ref: (1, C_in_p, S_pad)   keep_ref: (1, 1, Lext)
        # w_ref: (kh*kw, C_out_p, C_in_p)   b_ref: (C_out_p, 1)
        # o_ref: (1, C_out_p, Lext)
        xall = x_ref[0]                                  # whole padded image block
        acc = jnp.zeros((C_out_p, Lext), jnp.float32)
        for i in range(kh):
            for j in range(kw):
                d = i * Wp + j                           # flat shift of tap (i, j)
                xs = xall[:, d:d + Lext]                 # (C_in_p, Lext)
                acc = acc + jnp.dot(w_ref[i * kw + j], xs,
                                    preferred_element_type=jnp.float32)
        o_ref[0] = ((acc + b_ref[...]) * keep_ref[0]).astype(o_ref.dtype)

    isz, osz = cdt.itemsize, jnp.dtype(x.dtype).itemsize
    est = (2 * C_in_p * S_pad * isz                      # double-buffered image block
           + 2 * Lext * 4                                # keep row
           + 2 * C_out_p * Lext * osz                    # output block
           + C_out_p * Lext * 4                          # f32 accumulator
           + 2 * (kh * kw * C_out_p * C_in_p * isz + C_out_p * 4))
    vmem_limit = int(min(2 * est + (12 << 20), int(0.9 * _vmem_cap_bytes())))

    out = pl.pallas_call(
        kernel,
        out_shape=jax.ShapeDtypeStruct((B, C_out_p, Lext), x.dtype),
        grid=(B,),                                       # even grid when B even (v7x megacore)
        in_specs=[
            pl.BlockSpec((1, C_in_p, S_pad), lambda b: (b, 0, 0)),
            pl.BlockSpec((1, 1, Lext), lambda b: (b, 0, 0)),
            pl.BlockSpec((kh * kw, C_out_p, C_in_p), lambda b: (0, 0, 0)),
            pl.BlockSpec((C_out_p, 1), lambda b: (0, 0)),
        ],
        out_specs=pl.BlockSpec((1, C_out_p, Lext), lambda b: (b, 0, 0)),
        compiler_params=pltpu.CompilerParams(
            dimension_semantics=("parallel",),
            vmem_limit_bytes=vmem_limit),
    )(xflat, keep, wk, b2)

    return out.reshape(B, C_out_p, oh, Wp)[:, :C_out, :, :ow]


# --------------------- im2col GEMM path (stride > 1) ---------------------- #

def _gemm_kernel(xp_ref, keep_ref, w_ref, b_ref, o_ref):
    acc = jnp.dot(w_ref[...], xp_ref[...], preferred_element_type=jnp.float32)
    o_ref[...] = ((acc + b_ref[...]) * keep_ref[...]).astype(o_ref.dtype)


def _gemm_forward(x, mask, weight, bias, stride, padding, compute_dtype):
    B, C_in, H, W = x.shape
    C_out, _, kh, kw = weight.shape
    cdt = jnp.dtype(compute_dtype) if compute_dtype is not None else jnp.dtype(x.dtype)
    sub = 16 if cdt.itemsize < 4 else 8

    oh = (H + 2 * padding - kh) // stride + 1
    ow = (W + 2 * padding - kw) // stride + 1
    L, BL = oh * ow, B * oh * ow
    K = C_in * kh * kw
    Kp = _round_up(K, sub)
    C_out_p = _round_up(C_out, 8)

    # Patches built directly in (K, B*L) order (single transpose of the RAW tensor only).
    xt = jnp.transpose(x, (1, 0, 2, 3))                  # (C, B, H, W)
    xt = jnp.pad(xt, ((0, 0), (0, 0), (padding, padding), (padding, padding)))
    cols = [xt[:, :, i:i + stride * oh:stride, j:j + stride * ow:stride]
            for i in range(kh) for j in range(kw)]
    xp2d = jnp.stack(cols, axis=1).reshape(K, BL)        # row = c*kh*kw + i*kw + j
    xp2d = jnp.pad(xp2d, ((0, Kp - K), (0, 0))).astype(cdt)

    keep2d = _keep_mask(mask, kh, kw, stride, padding).reshape(1, BL)

    w2d = jnp.pad(weight.reshape(C_out, K),
                  ((0, C_out_p - C_out), (0, Kp - K))).astype(cdt)
    b2d = jnp.pad(bias.reshape(C_out, 1).astype(jnp.float32),
                  ((0, C_out_p - C_out), (0, 0)))

    # Lane tile from a VMEM budget (amortizes ~0.35us/grid-step); >=2 steps if possible.
    isz, osz = cdt.itemsize, jnp.dtype(x.dtype).itemsize
    per_col = 2 * Kp * isz + 2 * 4 + 2 * C_out_p * osz + C_out_p * 4
    Lt = max(128, min(8192, ((12 << 20) // per_col) // 128 * 128))
    Lt = min(Lt, _round_up(pl.cdiv(BL, 2), 128))
    n_tiles = pl.cdiv(BL, Lt)
    # No B*L padding pass: the cdiv grid's final partial block is padded by Pallas;
    # its garbage tail columns are never stored because out_shape is exactly
    # (C_out_p, BL).  Only the K (contraction) dim is explicitly zero-padded.

    est = per_col * Lt + 2 * (C_out_p * Kp * isz + C_out_p * 4)
    vmem_limit = int(min(2 * est + (12 << 20), int(0.9 * _vmem_cap_bytes())))

    out2d = pl.pallas_call(
        _gemm_kernel,
        out_shape=jax.ShapeDtypeStruct((C_out_p, BL), x.dtype),
        grid=(n_tiles,),
        in_specs=[
            pl.BlockSpec((Kp, Lt), lambda l: (0, l)),
            pl.BlockSpec((1, Lt), lambda l: (0, l)),
            pl.BlockSpec((C_out_p, Kp), lambda l: (0, 0)),
            pl.BlockSpec((C_out_p, 1), lambda l: (0, 0)),
        ],
        out_specs=pl.BlockSpec((C_out_p, Lt), lambda l: (0, l)),
        compiler_params=pltpu.CompilerParams(
            dimension_semantics=("parallel",),
            vmem_limit_bytes=vmem_limit),
    )(xp2d, keep2d, w2d, b2d)

    return out2d[:C_out].reshape(C_out, B, oh, ow).transpose(1, 0, 2, 3)


# -------------------------------- wrapper ---------------------------------- #

def my_conv_forward(x, mask, weight, bias, *, stride=1, padding=0,
                    dilation=1, groups=1, compute_dtype=None):
    """JAX/Pallas equivalent of MyConv.forward(x, mask)."""
    assert dilation == 1 and groups == 1, \
        "TODO(synk): dilation>1 / groups>1 not implemented (module defaults)"
    if stride == 1:
        return _fused_forward(x, mask, weight, bias, padding, compute_dtype)
    return _gemm_forward(x, mask, weight, bias, stride, padding, compute_dtype)


# ------------------------------- reference --------------------------------- #

def reference_forward(x, mask, weight, bias, *, stride=1, padding=0):
    """Pure-JAX reference of MyConv.forward semantics."""
    _, _, kh, kw = weight.shape
    B, _, H, W = x.shape
    conv = jax.lax.conv_general_dilated(
        x, weight, (stride, stride),
        [(padding, padding), (padding, padding)],
        dimension_numbers=("NCHW", "OIHW", "NCHW"))
    conv = conv + bias[None, :, None, None]
    oh = (H + 2 * padding - kh) // stride + 1
    ow = (W + 2 * padding - kw) // stride + 1
    mp = jnp.pad(mask, ((0, 0), (0, 0), (padding, padding), (padding, padding)))
    cols = [mp[:, :, i:i + stride * oh:stride, j:j + stride * ow:stride]
            for i in range(kh) for j in range(kw)]
    patches = jnp.stack(cols, axis=2)                     # (B, C, kh*kw, oh, ow)
    keep = jnp.any(patches != 0, axis=(1, 2))[:, None]    # (B, 1, oh, ow)
    return jnp.where(keep, conv, 0.0)


if __name__ == "__main__":
    B, C_in, C_out, H, W = 2, 4, 8, 16, 16
    kh = kw = 3

    key = jax.random.PRNGKey(0)
    kx, kwk, kb = jax.random.split(key, 3)
    x = jax.random.normal(kx, (B, C_in, H, W), jnp.float32)
    weight = jax.random.normal(kwk, (C_out, C_in, kh, kw), jnp.float32) * 0.1
    bias = jax.random.normal(kb, (C_out,), jnp.float32) * 0.1
    # Mask nonzero only in a rectangle; receptive fields fully outside it must
    # produce exact zeros (bias included).
    mask = jnp.zeros((B, C_in, H, W), jnp.float32).at[:, :, 4:12, 4:12].set(1.0)

    # 1) fused path (stride=1, padding=1), f32 compute -> exact vs reference.
    out = jax.block_until_ready(
        my_conv_forward(x, mask, weight, bias, stride=1, padding=1))
    ref = reference_forward(x, mask, weight, bias, stride=1, padding=1)
    assert out.shape == (B, C_out, H, W), out.shape
    assert jnp.allclose(out, ref, atol=1e-4, rtol=1e-4), "fused f32 mismatch"

    # 2) fused path with bf16 inputs + f32 accumulation (recommended production mode).
    out_bf = jax.block_until_ready(
        my_conv_forward(x, mask, weight, bias, stride=1, padding=1,
                        compute_dtype=jnp.bfloat16))
    assert jnp.allclose(out_bf, ref, atol=5e-2, rtol=5e-2), "fused bf16 mismatch"

    # 3) strided fallback (im2col GEMM path), stride=2.
    out_s = jax.block_until_ready(
        my_conv_forward(x, mask, weight, bias, stride=2, padding=1))
    ref_s = reference_forward(x, mask, weight, bias, stride=2, padding=1)
    assert out_s.shape == ref_s.shape, (out_s.shape, ref_s.shape)
    assert jnp.allclose(out_s, ref_s, atol=1e-4, rtol=1e-4), "gemm stride-2 mismatch"

    print("KERNEL_OK")
</pallas_src>

<mosaic_0001>
module attributes {stable_mosaic.version = 11 : i64} {
  func.func @kernel(%arg0: i32, %arg1: memref<1x8x384xf32, #tpu.memory_space<vmem>>, %arg2: memref<1x1x288xf32, #tpu.memory_space<vmem>>, %arg3: memref<9x8x8xf32, #tpu.memory_space<vmem>>, %arg4: memref<8x1xf32, #tpu.memory_space<vmem>>, %arg5: memref<1x8x288xf32, #tpu.memory_space<vmem>>) attributes {dimension_semantics = [#tpu.dimension_semantics<parallel>], iteration_bounds = array<i64: 2>, scalar_prefetch = 0 : i64, scratch_operands = 0 : i64, tpu.core_type = #tpu.core_type<tc>, window_params = [{transform_indices = @transform_0, window_bounds = array<i64: 1, 8, 384>}, {transform_indices = @transform_1, window_bounds = array<i64: 1, 1, 288>}, {pipeline_mode = #tpu.pipeline_mode<synchronous>, transform_indices = @transform_2, window_bounds = array<i64: 9, 8, 8>}, {pipeline_mode = #tpu.pipeline_mode<synchronous>, transform_indices = @transform_3, window_bounds = array<i64: 8, 1>}, {transform_indices = @transform_4, window_bounds = array<i64: 1, 8, 288>}]} {
    %c0 = arith.constant 0 : index
    %c0_0 = arith.constant 0 : index
    %c0_1 = arith.constant 0 : index
    %0 = vector.load %arg1[%c0, %c0_0, %c0_1] : memref<1x8x384xf32, #tpu.memory_space<vmem>>, vector<1x8x384xf32>
    %1 = vector.shape_cast %0 : vector<1x8x384xf32> to vector<8x384xf32>
    %cst = arith.constant 0.000000e+00 : f32
    %2 = vector.broadcast %cst : f32 to vector<8x288xf32>
    %3 = vector.extract_strided_slice %1 {offsets = [0, 0], sizes = [8, 288], strides = [1, 1]} : vector<8x384xf32> to vector<8x288xf32>
    %c0_2 = arith.constant 0 : index
    %c0_3 = arith.constant 0 : index
    %c0_4 = arith.constant 0 : index
    %4 = vector.load %arg3[%c0_2, %c0_3, %c0_4] : memref<9x8x8xf32, #tpu.memory_space<vmem>>, vector<1x8x8xf32>
    %5 = vector.shape_cast %4 : vector<1x8x8xf32> to vector<8x8xf32>
    %cst_5 = arith.constant dense<0.000000e+00> : vector<8x288xf32>
    %6 = tpu.matmul %5, %3, %cst_5 {dimension_numbers = #tpu.dot_dimension_numbers<[1], [0], [0], [1], [0, 0, 1, 1], [], []>} : vector<8x8xf32>, vector<8x288xf32>, vector<8x288xf32> -> vector<8x288xf32>
    %7 = arith.addf %2, %6 : vector<8x288xf32>
    %8 = vector.extract_strided_slice %1 {offsets = [0, 1], sizes = [8, 288], strides = [1, 1]} : vector<8x384xf32> to vector<8x288xf32>
    %c1 = arith.constant 1 : index
    %c0_6 = arith.constant 0 : index
    %c0_7 = arith.constant 0 : index
    %9 = vector.load %arg3[%c1, %c0_6, %c0_7] : memref<9x8x8xf32, #tpu.memory_space<vmem>>, vector<1x8x8xf32>
    %10 = vector.shape_cast %9 : vector<1x8x8xf32> to vector<8x8xf32>
    %cst_8 = arith.constant dense<0.000000e+00> : vector<8x288xf32>
    %11 = tpu.matmul %10, %8, %cst_8 {dimension_numbers = #tpu.dot_dimension_numbers<[1], [0], [0], [1], [0, 0, 1, 1], [], []>} : vector<8x8xf32>, vector<8x288xf32>, vector<8x288xf32> -> vector<8x288xf32>
    %12 = arith.addf %7, %11 : vector<8x288xf32>
    %13 = vector.extract_strided_slice %1 {offsets = [0, 2], sizes = [8, 288], strides = [1, 1]} : vector<8x384xf32> to vector<8x288xf32>
    %c2 = arith.constant 2 : index
    %c0_9 = arith.constant 0 : index
    %c0_10 = arith.constant 0 : index
    %14 = vector.load %arg3[%c2, %c0_9, %c0_10] : memref<9x8x8xf32, #tpu.memory_space<vmem>>, vector<1x8x8xf32>
    %15 = vector.shape_cast %14 : vector<1x8x8xf32> to vector<8x8xf32>
    %cst_11 = arith.constant dense<0.000000e+00> : vector<8x288xf32>
    %16 = tpu.matmul %15, %13, %cst_11 {dimension_numbers = #tpu.dot_dimension_numbers<[1], [0], [0], [1], [0, 0, 1, 1], [], []>} : vector<8x8xf32>, vector<8x288xf32>, vector<8x288xf32> -> vector<8x288xf32>
    %17 = arith.addf %12, %16 : vector<8x288xf32>
    %18 = vector.extract_strided_slice %1 {offsets = [0, 18], sizes = [8, 288], strides = [1, 1]} : vector<8x384xf32> to vector<8x288xf32>
    %c3 = arith.constant 3 : index
    %c0_12 = arith.constant 0 : index
    %c0_13 = arith.constant 0 : index
    %19 = vector.load %arg3[%c3, %c0_12, %c0_13] : memref<9x8x8xf32, #tpu.memory_space<vmem>>, vector<1x8x8xf32>
    %20 = vector.shape_cast %19 : vector<1x8x8xf32> to vector<8x8xf32>
    %cst_14 = arith.constant dense<0.000000e+00> : vector<8x288xf32>
    %21 = tpu.matmul %20, %18, %cst_14 {dimension_numbers = #tpu.dot_dimension_numbers<[1], [0], [0], [1], [0, 0, 1, 1], [], []>} : vector<8x8xf32>, vector<8x288xf32>, vector<8x288xf32> -> vector<8x288xf32>
    %22 = arith.addf %17, %21 : vector<8x288xf32>
    %23 = vector.extract_strided_slice %1 {offsets = [0, 19], sizes = [8, 288], strides = [1, 1]} : vector<8x384xf32> to vector<8x288xf32>
    %c4 = arith.constant 4 : index
    %c0_15 = arith.constant 0 : index
    %c0_16 = arith.constant 0 : index
    %24 = vector.load %arg3[%c4, %c0_15, %c0_16] : memref<9x8x8xf32, #tpu.memory_space<vmem>>, vector<1x8x8xf32>
    %25 = vector.shape_cast %24 : vector<1x8x8xf32> to vector<8x8xf32>
    %cst_17 = arith.constant dense<0.000000e+00> : vector<8x288xf32>
    %26 = tpu.matmul %25, %23, %cst_17 {dimension_numbers = #tpu.dot_dimension_numbers<[1], [0], [0], [1], [0, 0, 1, 1], [], []>} : vector<8x8xf32>, vector<8x288xf32>, vector<8x288xf32> -> vector<8x288xf32>
    %27 = arith.addf %22, %26 : vector<8x288xf32>
    %28 = vector.extract_strided_slice %1 {offsets = [0, 20], sizes = [8, 288], strides = [1, 1]} : vector<8x384xf32> to vector<8x288xf32>
    %c5 = arith.constant 5 : index
    %c0_18 = arith.constant 0 : index
    %c0_19 = arith.constant 0 : index
    %29 = vector.load %arg3[%c5, %c0_18, %c0_19] : memref<9x8x8xf32, #tpu.memory_space<vmem>>, vector<1x8x8xf32>
    %30 = vector.shape_cast %29 : vector<1x8x8xf32> to vector<8x8xf32>
    %cst_20 = arith.constant dense<0.000000e+00> : vector<8x288xf32>
    %31 = tpu.matmul %30, %28, %cst_20 {dimension_numbers = #tpu.dot_dimension_numbers<[1], [0], [0], [1], [0, 0, 1, 1], [], []>} : vector<8x8xf32>, vector<8x288xf32>, vector<8x288xf32> -> vector<8x288xf32>
    %32 = arith.addf %27, %31 : vector<8x288xf32>
    %33 = vector.extract_strided_slice %1 {offsets = [0, 36], sizes = [8, 288], strides = [1, 1]} : vector<8x384xf32> to vector<8x288xf32>
    %c6 = arith.constant 6 : index
    %c0_21 = arith.constant 0 : index
    %c0_22 = arith.constant 0 : index
    %34 = vector.load %arg3[%c6, %c0_21, %c0_22] : memref<9x8x8xf32, #tpu.memory_space<vmem>>, vector<1x8x8xf32>
    %35 = vector.shape_cast %34 : vector<1x8x8xf32> to vector<8x8xf32>
    %cst_23 = arith.constant dense<0.000000e+00> : vector<8x288xf32>
    %36 = tpu.matmul %35, %33, %cst_23 {dimension_numbers = #tpu.dot_dimension_numbers<[1], [0], [0], [1], [0, 0, 1, 1], [], []>} : vector<8x8xf32>, vector<8x288xf32>, vector<8x288xf32> -> vector<8x288xf32>
    %37 = arith.addf %32, %36 : vector<8x288xf32>
    %38 = vector.extract_strided_slice %1 {offsets = [0, 37], sizes = [8, 288], strides = [1, 1]} : vector<8x384xf32> to vector<8x288xf32>
    %c7 = arith.constant 7 : index
    %c0_24 = arith.constant 0 : index
    %c0_25 = arith.constant 0 : index
    %39 = vector.load %arg3[%c7, %c0_24, %c0_25] : memref<9x8x8xf32, #tpu.memory_space<vmem>>, vector<1x8x8xf32>
    %40 = vector.shape_cast %39 : vector<1x8x8xf32> to vector<8x8xf32>
    %cst_26 = arith.constant dense<0.000000e+00> : vector<8x288xf32>
    %41 = tpu.matmul %40, %38, %cst_26 {dimension_numbers = #tpu.dot_dimension_numbers<[1], [0], [0], [1], [0, 0, 1, 1], [], []>} : vector<8x8xf32>, vector<8x288xf32>, vector<8x288xf32> -> vector<8x288xf32>
    %42 = arith.addf %37, %41 : vector<8x288xf32>
    %43 = vector.extract_strided_slice %1 {offsets = [0, 38], sizes = [8, 288], strides = [1, 1]} : vector<8x384xf32> to vector<8x288xf32>
    %c8 = arith.constant 8 : index
    %c0_27 = arith.constant 0 : index
    %c0_28 = arith.constant 0 : index
    %44 = vector.load %arg3[%c8, %c0_27, %c0_28] : memref<9x8x8xf32, #tpu.memory_space<vmem>>, vector<1x8x8xf32>
    %45 = vector.shape_cast %44 : vector<1x8x8xf32> to vector<8x8xf32>
    %cst_29 = arith.constant dense<0.000000e+00> : vector<8x288xf32>
    %46 = tpu.matmul %45, %43, %cst_29 {dimension_numbers = #tpu.dot_dimension_numbers<[1], [0], [0], [1], [0, 0, 1, 1], [], []>} : vector<8x8xf32>, vector<8x288xf32>, vector<8x288xf32> -> vector<8x288xf32>
    %47 = arith.addf %42, %46 : vector<8x288xf32>
    %c0_30 = arith.constant 0 : index
    %c0_31 = arith.constant 0 : index
    %48 = vector.load %arg4[%c0_30, %c0_31] : memref<8x1xf32, #tpu.memory_space<vmem>>, vector<8x1xf32>
    %49 = vector.broadcast %48 : vector<8x1xf32> to vector<8x288xf32>
    %50 = arith.addf %47, %49 : vector<8x288xf32>
    %c0_32 = arith.constant 0 : index
    %c0_33 = arith.constant 0 : index
    %c0_34 = arith.constant 0 : index
    %51 = vector.load %arg2[%c0_32, %c0_33, %c0_34] : memref<1x1x288xf32, #tpu.memory_space<vmem>>, vector<1x1x288xf32>
    %52 = vector.shape_cast %51 : vector<1x1x288xf32> to vector<1x288xf32>
    %53 = vector.broadcast %52 : vector<1x288xf32> to vector<8x288xf32>
    %54 = arith.mulf %50, %53 : vector<8x288xf32>
    %c0_35 = arith.constant 0 : index
    %c0_36 = arith.constant 0 : index
    %c0_37 = arith.constant 0 : index
    %55 = vector.load %arg5[%c0_35, %c0_36, %c0_37] : memref<1x8x288xf32, #tpu.memory_space<vmem>>, vector<1x8x288xf32>
    %56 = vector.shape_cast %55 : vector<1x8x288xf32> to vector<8x288xf32>
    %57 = vector.shape_cast %54 : vector<8x288xf32> to vector<1x8x288xf32>
    tpu.vector_store %arg5[%c0_35, %c0_36, %c0_37], %57 {strides = array<i32>} : memref<1x8x288xf32, #tpu.memory_space<vmem>>, vector<1x8x288xf32>,
    return
  }
  func.func @transform_0(%arg0: i32) -> (i32, i32, i32) {
    %c0_i32 = arith.constant 0 : i32
    %c0_i32_0 = arith.constant 0 : i32
    %c0_i32_1 = arith.constant 0 : i32
    return %arg0, %c0_i32, %c0_i32_0 : i32, i32, i32
  }
  func.func @transform_1(%arg0: i32) -> (i32, i32, i32) {
    %c0_i32 = arith.constant 0 : i32
    %c0_i32_0 = arith.constant 0 : i32
    %c0_i32_1 = arith.constant 0 : i32
    return %arg0, %c0_i32, %c0_i32_0 : i32, i32, i32
  }
  func.func @transform_2(%arg0: i32) -> (i32, i32, i32) {
    %c0_i32 = arith.constant 0 : i32
    %c0_i32_0 = arith.constant 0 : i32
    %c0_i32_1 = arith.constant 0 : i32
    %c0_i32_2 = arith.constant 0 : i32
    return %c0_i32, %c0_i32_0, %c0_i32_1 : i32, i32, i32
  }
  func.func @transform_3(%arg0: i32) -> (i32, i32) {
    %c0_i32 = arith.constant 0 : i32
    %c0_i32_0 = arith.constant 0 : i32
    %c0_i32_1 = arith.constant 0 : i32
    return %c0_i32, %c0_i32_0 : i32, i32
  }
  func.func @transform_4(%arg0: i32) -> (i32, i32, i32) {
    %c0_i32 = arith.constant 0 : i32
    %c0_i32_0 = arith.constant 0 : i32
    %c0_i32_1 = arith.constant 0 : i32
    return %arg0, %c0_i32, %c0_i32_0 : i32, i32, i32
  }
}

</mosaic_0001>

<bundles_post_ra>
// kernel: tpu_custom_call.1
= control target key start
LH: loop header
LB: loop body
LE: loop exit
PB: predicated region body
PF: predicated region fallthrough
CT: control target
= control target key end

     0   :  { %9 = vsyncpa [#allocation3], 0  ;;  %s2239_s0 = inlined_call_operand.vmem [shape: f32[2,8,384], index: 0, kind: input, shape index: {}]   ;;  %s2240_s1 = inlined_call_operand.vmem [shape: f32[2,1,288], index: 1, kind: input, shape index: {}]   ;;  %s2241_s2 = inlined_call_operand.vmem [shape: f32[9,8,8], index: 2, kind: input, shape index: {}]   ;;  %s2242_s3 = inlined_call_operand.vmem [shape: f32[8,1], index: 3, kind: input, shape index: {}]   ;;  %s2243_s4 = inlined_call_operand.hbm [shape: f32[2,8,288], index: 4, kind: output, shape index: {}]  }
   0x1   :  { %11 = vsyncpa [#allocation3 + $0x1], 0  ;;  %s2038_s15 = smov 0   ;;  %s2040_s16 = smov 0  }
   0x2   :  { %s2042_s17 = smov 0   ;;  %s2044_s18 = smov 0  }
   0x3 LB: > { %s2059_s19 = sadd.s32 4294967295, %s1999_s18   ;;  %s1769_s20 = sadd.s32 4294967294, %s1999_s18   ;;  %s1999_s18 = sphi %s2044_s18, %s2249_s18   ;;  %s1995_s17 = sphi %s2042_s17, %s2248_s17   ;;  %s1991_s16 = sphi %s2040_s16, %s2247_s16   ;;  %s1987_s15 = sphi %s2038_s15, %s2246_s15  }
   0x4   : > { %s2063_s21 = sadd.s32 1, %s1999_s18   ;;  %s118_s22 = sadd.s32 1, %s1995_s17 }
   0x5   : > { %s115_s23 = ssub.s32 %s1999_s18, %s2063_s21  ;;  %p128_p0 = scmp.ne.s32.totalorder %s1995_s17, %s1991_s16 }
   0x6   : > { %p116_p1 = scmp.eq.s32.totalorder %s115_s23, 0  ;;  %p129_p2 = scmp.eq.s32.totalorder %s2059_s19, 1 }
   0x7   : > { %p134_p3 = scmp.ne.s32.totalorder %s1991_s16, %s1987_s15  ;;  %p135_p4 = scmp.eq.s32.totalorder %s1769_s20, 1 }
   0x8   : > { %s2074_s24 = scalar_select %p116_p1, %s1995_s17, %s118_s22  }
   0x9   : > { %p2076_p5 = por %p129_p2, %p128_p0  ;;  %p2080_p6 = por %p135_p4, %p134_p3 }
   0xa   : > { %p1772_p7 = scmp.ge.s32.totalorder %s1999_s18, 1  ;;  %p174_p8 = scmp.lt.s32.totalorder %s1999_s18, 3 }
   0xc   : > { %p175_p9 = pnand %p1772_p7, %p174_p8 }
   0xd   : > { %p204_p10 = scmp.lt.s32.totalorder (!%p175_p9), %s2059_s19, 1  ;;  %v2001_v0 = vmov (!%p175_p9), 0.0   ;;  %vm2002_vm0 = vmmov (!%p175_p9), 0   ;;  %s2003_s6 = smov (!%p175_p9), 127   ;;  %v1650_v4 = vld [vmem:[%s2242_s3] sm:$0xff] (!%p175_p9)  ;;  %v2011_v5 = vmov (!%p175_p9), 0  }
   0xe   : > { %178 = sbr.rel (%p175_p9) target bundleno = 444 (0x1bc), region = 36  ;;  %1821 = vmatprep.subr.mxu1 (!%p175_p9), %v2001_v0  ;;  %302 = vmatprep.mubr.f32.mxu0 (!%p175_p9), %v2001_v0  ;;  %s2004_s7 = smov (!%p175_p9), 126   ;;  %vm228_vm1 = vcmask (!%p175_p9), 1039360   ;;  %v1774_v11 = vld [vmem:[%s2241_s2 + $0x8] sm:$0xff] (!%p175_p9)  ;;  %vm234_vm2 = vcmask (!%p175_p9), 64512   ;;  %vm531_vm3 = vcmask (!%p175_p9), 1031168  }
   0xf   : > { %1823 = vmatprep.mubr.msk.f32.mxu1 (!%p175_p9), %vm2002_vm0, %v2001_v0  ;;  %s2005_s8 = smov (!%p175_p9), 110   ;;  %s2006_s9 = smov (!%p175_p9), 109   ;;  %1936 = vset.pattern.permute.xlu0 (!%p175_p9), %v2011_v5  ;;  %v216_v16 = vld [vmem:[%s2241_s2] sm:$0xff] (!%p175_p9)  ;;  %vm692_vm4 = vcmask (!%p175_p9), 900096   ;;  %v1779_v20 = vld [vmem:[%s2241_s2 + $0x10] sm:$0xff] (!%p175_p9)  ;;  %v1782_v24 = vld [vmem:[%s2241_s2 + $0x18] sm:$0xff] (!%p175_p9) }
  0x10   : > { %s2007_s10 = smov (!%p175_p9), 108   ;;  %s2008_s11 = smov (!%p175_p9), 92   ;;  %vm853_vm5 = vcmask (!%p175_p9), 891904   ;;  %v1785_v27 = vld [vmem:[%s2241_s2 + $0x20] sm:$0xff] (!%p175_p9)  ;;  %v1788_v32 = vld [vmem:[%s2241_s2 + $0x28] sm:$0xff] (!%p175_p9)  ;;  %vm1014_vm6 = vcmask (!%p175_p9), 883712  }
  0x11   : > { %s2009_s12 = smov (!%p175_p9), 91   ;;  %s2010_s13 = smov (!%p175_p9), 90   ;;  %v1791_v39 = vld [vmem:[%s2241_s2 + $0x30] sm:$0xff] (!%p175_p9)  ;;  %vm1175_vm7 = vcmask (!%p175_p9), 752640   ;;  %v1794_v42 = vld [vmem:[%s2241_s2 + $0x38] sm:$0xff] (!%p175_p9)  ;;  %v1797_v46 = vld [vmem:[%s2241_s2 + $0x40] sm:$0xff] (!%p175_p9) }
  0x12   : > { %vm1336_vm8 = vcmask (!%p175_p9), 744448   ;;  %vm1497_vm9 = vcmask (!%p175_p9), 736256   ;;  %vm1681_vm10 = vcmask (!%p175_p9), 261120   ;;  %s2012_s14 = smov (!%p175_p9), [#allocation2]  }
  0x13   : > { %s1941_s20 = sshll.u32 (!%p175_p9), %s2012_s14, 4  ;;  %s1942_s20 = int_to_ptr.vmem [resolvable:$false] %s1941_s20 }
  0x14   : > { %s1943_s22 = scalar_lea.vmem (!%p175_p9), %s1942_s20, 768 }
  0x15   : > { %s2090_s27 = scalar_select %p204_p10, %s2059_s19, 1 }
  0x17   : > { %s1883_s28 = smul.u32 24, %s2090_s27 }
  0x19   : > { %s208_s5 = scalar_lea.vmem %s2239_s0, %s1883_s28  ;;  %s1884_s28 = smul.u32 3, %s2090_s27 }
  0x1a   : > { %v214_v1 = vld [vmem:[%s208_s5 + $0x8] sm:$0xff]  ;;  %v213_v2 = vld [vmem:[%s208_s5] sm:$0xff]  ;;  %v215_v3 = vld [vmem:[%s208_s5 + $0x10] sm:$0xff] }
  0x1b   : > { %224 = vrot.lane.b32.xlu0 %v214_v1, %s2003_s6  ;;  %222 = vrot.lane.b32.xlu1 %v213_v2, %s2003_s6  ;;  %s212_s5 = scalar_lea.vmem %s2240_s1, %s1884_s28 }
  0x1f   : > { %226 = vrot.lane.b32.xlu0 %v215_v3, %s2003_s6  ;;  %527 = vrot.lane.b32.xlu1 %v214_v1, %s2004_s7  ;;  %s201_s6 = sand.u32 1, %s1991_s16  }
  0x23   : > { %529 = vrot.lane.b32.xlu0 %v215_v3, %s2004_s7  ;;  %525 = vrot.lane.b32.xlu1 %v213_v2, %s2004_s7  ;;  %s1882_s7 = smul.u32 24, %s201_s6 }
  0x25   : > { %s203_s27 = scalar_lea.vmem [#allocation2], %s1882_s7 }
  0x27   : > { %688 = vrot.lane.b32.xlu0 %v214_v1, %s2005_s8  ;;  %690 = vrot.lane.b32.xlu1 %v215_v3, %s2005_s8 }
  0x2b   : > { %686 = vrot.lane.b32.xlu0 %v213_v2, %s2005_s8  ;;  %849 = vrot.lane.b32.xlu1 %v214_v1, %s2006_s9  ;;  %s1885_s8 = smul.u32 384, %s2059_s19 }
  0x2f   : > { %851 = vrot.lane.b32.xlu0 %v215_v3, %s2006_s9  ;;  %847 = vrot.lane.b32.xlu1 %v213_v2, %s2006_s9  ;;  %s1698_s9 = sshll.u32 %s203_s27, 4  ;;  %s2199_s9 = int_to_ptr.vmem [resolvable:$true] %s1698_s9 }
  0x30   : > { %s1937_s19 = scalar_lea.vmem %s2199_s9, 384  ;;  %p1944_p0 = scmp.lt.s32.totalorder %s2199_s9, %s1942_s20 }
  0x31   : > { %p1938_p11 = scmp.ne.s32.totalorder %s2199_s9, %s1937_s19  ;;  %p1945_p1 = scmp.lt.s32.totalorder %s1943_s22, %s1937_s19 }
  0x33   : > { %1010 = vrot.lane.b32.xlu0 %v214_v1, %s2007_s10  ;;  %1012 = vrot.lane.b32.xlu1 %v215_v3, %s2007_s10  ;;  %p1939_p12 = pnand %p1938_p11, %p2076_p5  ;;  %p1946_p2 = por %p1945_p1, %p1944_p0 }
  0x35   : > { %p1940_p13 = pneg %p1939_p12 }
  0x37   : > { %1008 = vrot.lane.b32.xlu0 %v213_v2, %s2007_s10  ;;  %1171 = vrot.lane.b32.xlu1 %v214_v1, %s2008_s11  ;;  %p1947_p3 = pnand %p1946_p2, %p1940_p13 }
  0x3b   : > { %1173 = vrot.lane.b32.xlu0 %v215_v3, %s2008_s11  ;;  %1169 = vrot.lane.b32.xlu1 %v213_v2, %s2008_s11 }
  0x3f   : > { %1332 = vrot.lane.b32.xlu0 %v214_v1, %s2009_s12  ;;  %1334 = vrot.lane.b32.xlu1 %v215_v3, %s2009_s12 }
  0x43   : > { %1330 = vrot.lane.b32.xlu0 %v213_v2, %s2009_s12  ;;  %1493 = vrot.lane.b32.xlu1 %v214_v1, %s2010_s13  ;;  %s2197_s12 = scalar_lea.hbm %s2243_s4, %s1885_s8 }
  0x47   : > { %1495 = vrot.lane.b32.xlu0 %v215_v3, %s2010_s13  ;;  %1491 = vrot.lane.b32.xlu1 %v213_v2, %s2010_s13  ;;  %s1684_s13 = scalar_lea.sflag [#allocation3], %s201_s6 }
  0x4b   : > { %1653 = vperm.xlu0 %1936, %v1650_v4  }
  0x8d   : > { %v225_v6 = vpop.permute.xlu0 %224  ;;  %v223_v7 = vpop.permute.xlu1 %222 }
  0x8e   : > { %v229_v12 = vsel %vm228_vm1, %v223_v7, %v225_v6 }
  0x91   : > { %v227_v8 = vpop.permute.xlu0 %226  ;;  %v528_v9 = vpop.permute.xlu1 %527 }
  0x92   : > { %1822 = vmatpush3.msra.mxu1 %v227_v8  ;;  %v230_v10 = vsel %vm228_vm1, %v225_v6, %v227_v8 }
  0x93   : > { %238 = vmatprep.subr.mxu0 %v230_v10  ;;  %1824 = vmatmul.mubr.msk.f32.vlgmr.msra.gmra.mrb[0].mxu1 %vm234_vm2, %v1774_v11 }
  0x94   : > { %239 = vmatpush1.msra.mxu0 %v229_v12  ;;  %1826 = vmatprep.subr.mxu1 %v2001_v0 }
  0x95   : > { %1775 = vmatmul.mubr.msk.f32.vlgmr.msra.gmra.mrb[0].mxu0 %vm234_vm2, %v1774_v11  ;;  %382 = vmatprep.subr.mxu0 %v214_v1  ;;  %v530_v13 = vpop.permute.xlu0 %529  ;;  %v526_v14 = vpop.permute.xlu1 %525 }
  0x96   : > { %383 = vmatpush1.msra.mxu0 %v213_v2  ;;  %1827 = vmatpush3.msra.mxu1 %v215_v3  ;;  %v533_v15 = vsel %vm531_vm3, %v528_v9, %v530_v13  ;;  %v532_v19 = vsel %vm531_vm3, %v526_v14, %v528_v9  ;;  %v1661_v9 = vlaneseq }
  0x97   : > { %540 = vmatprep.subr.mxu0 %v533_v15  ;;  %1828 = vmatprep.mubr.msk.f32.mxu1 %vm2002_vm0, %v2001_v0 }
  0x98   : > { %1831 = vmatprep.subr.mxu1 %v2001_v0  ;;  %1829 = vmatmul.mubr.msk.f32.vlgmr.msra.gmra.mrb[2].mxu1 %vm234_vm2, %v216_v16 }
  0x99   : > { %1832 = vmatpush3.msra.mxu1 %v530_v13  ;;  %v689_v17 = vpop.permute.xlu0 %688  ;;  %446 = vmatprep.mubr.f32.mxu0 %v2001_v0  ;;  %v691_v18 = vpop.permute.xlu1 %690  ;;  %v1662_v13 = vshrl.u32 %v1661_v9, 7 }
  0x9a   : > { %1833 = vmatprep.mubr.msk.f32.mxu1 %vm2002_vm0, %v2001_v0  ;;  %1836 = vmatprep.subr.mxu1 %v2001_v0  ;;  %v694_v21 = vsel %vm692_vm4, %v689_v17, %v691_v18 }
  0x9c   : > { %1834 = vmatmul.mubr.msk.f32.vlgmr.msra.gmra.mrb[4].mxu1 %vm234_vm2, %v1779_v20 }
  0x9d   : > { %1777 = vmatmul.mubr.msk.f32.vlgmr.msra.gmra.mrb[0].mxu0 %vm234_vm2, %v216_v16  ;;  %v687_v22 = vpop.permute.xlu0 %686  ;;  %1837 = vmatpush3.msra.mxu1 %v691_v18  ;;  %v850_v23 = vpop.permute.xlu1 %849  ;;  %v1671_v16 = vsub.s32 2, %v1662_v13 }
  0x9e   : > { %541 = vmatpush1.msra.mxu0 %v532_v19  ;;  %604 = vmatprep.mubr.f32.mxu0 %v2001_v0  ;;  %v693_v28 = vsel %vm692_vm4, %v687_v22, %v689_v17  ;;  %v1659_v17 = vld [vmem:[%s212_s5] sm:$0x7] }
  0x9f   : > { %701 = vmatprep.subr.mxu0 %v694_v21  ;;  %1838 = vmatprep.mubr.msk.f32.mxu1 %vm2002_vm0, %v2001_v0  ;;  %v1672_v21 = vrot.slane %v1659_v17, %v1671_v16 }
  0xa0   : > { %1841 = vmatprep.subr.mxu1 %v2001_v0  ;;  %1839 = vmatmul.mubr.msk.f32.vlgmr.msra.gmra.mrb[6].mxu1 %vm234_vm2, %v1782_v24 }
  0xa1   : > { %v852_v25 = vpop.permute.xlu0 %851  ;;  %v848_v26 = vpop.permute.xlu1 %847  ;;  %1843 = vmatprep.mubr.msk.f32.mxu1 %vm2002_vm0, %v2001_v0 }
  0xa2   : > { %1842 = vmatpush3.msra.mxu1 %v852_v25  ;;  %v855_v29 = vsel %vm853_vm5, %v850_v23, %v852_v25  ;;  %v854_v35 = vsel %vm853_vm5, %v848_v26, %v850_v23  ;;  %v1663_v25 = vsub.s32 0, %v1662_v13  ;;  %v1667_v26 = vsub.s32 1, %v1662_v13 }
  0xa3   : > { %1846 = vmatprep.subr.mxu1 %v2001_v0 }
  0xa4   : > { %1844 = vmatmul.mubr.msk.f32.vlgmr.msra.gmra.mrb[8].mxu1 %vm234_vm2, %v1785_v27 }
  0xa5   : > { %1780 = vmatmul.mubr.msk.f32.vlgmr.msra.gmra.mrb[0].mxu0 %vm234_vm2, %v1779_v20  ;;  %v1011_v30 = vpop.permute.xlu0 %1010  ;;  %v1013_v31 = vpop.permute.xlu1 %1012  ;;  %1848 = vmatprep.mubr.msk.f32.mxu1 %vm2002_vm0, %v2001_v0 }
  0xa6   : > { %702 = vmatpush1.msra.mxu0 %v693_v28  ;;  %765 = vmatprep.mubr.f32.mxu0 %v2001_v0  ;;  %v1016_v36 = vsel %vm1014_vm6, %v1011_v30, %v1013_v31 }
  0xa7   : > { %862 = vmatprep.subr.mxu0 %v855_v29  ;;  %1847 = vmatpush3.msra.mxu1 %v1013_v31  ;;  %v1668_v29 = vrot.slane %v1659_v17, %v1667_v26 }
  0xa8   : > { %1849 = vmatmul.mubr.msk.f32.vlgmr.msra.gmra.mrb[10].mxu1 %vm234_vm2, %v1788_v32  ;;  %1851 = vmatprep.subr.mxu1 %v2001_v0 }
  0xa9   : > { %v1009_v33 = vpop.permute.xlu0 %1008  ;;  %v1172_v34 = vpop.permute.xlu1 %1171  ;;  %1853 = vmatprep.mubr.msk.f32.mxu1 %vm2002_vm0, %v2001_v0 }
  0xaa   : > { %v1015_v43 = vsel %vm1014_vm6, %v1009_v33, %v1011_v30 }
  0xad   : > { %1783 = vmatmul.mubr.msk.f32.vlgmr.msra.gmra.mrb[0].mxu0 %vm234_vm2, %v1782_v24  ;;  %v1174_v37 = vpop.permute.xlu0 %1173  ;;  %v1170_v38 = vpop.permute.xlu1 %1169 }
  0xae   : > { %863 = vmatpush1.msra.mxu0 %v854_v35  ;;  %926 = vmatprep.mubr.f32.mxu0 %v2001_v0  ;;  %v1177_v44 = vsel %vm1175_vm7, %v1172_v34, %v1174_v37  ;;  %v1176_v48 = vsel %vm1175_vm7, %v1170_v38, %v1172_v34 }
  0xaf   : > { %1023 = vmatprep.subr.mxu0 %v1016_v36  ;;  %1852 = vmatpush3.msra.mxu1 %v1174_v37 }
  0xb0   : > { %1854 = vmatmul.mubr.msk.f32.vlgmr.msra.gmra.mrb[12].mxu1 %vm234_vm2, %v1791_v39  ;;  %1856 = vmatprep.subr.mxu1 %v2001_v0 }
  0xb1   : > { %v1333_v40 = vpop.permute.xlu0 %1332  ;;  %v1335_v41 = vpop.permute.xlu1 %1334  ;;  %1858 = vmatprep.mubr.msk.f32.mxu1 %vm2002_vm0, %v2001_v0 }
  0xb2   : > { %1857 = vmatpush3.msra.mxu1 %v1335_v41  ;;  %v1338_v49 = vsel %vm1336_vm8, %v1333_v40, %v1335_v41 }
  0xb3   : > { %1861 = vmatprep.subr.mxu1 %v2001_v0 }
  0xb4   : > { %1859 = vmatmul.mubr.msk.f32.vlgmr.msra.gmra.mrb[14].mxu1 %vm234_vm2, %v1794_v42 }
  0xb5   : > { %1786 = vmatmul.mubr.msk.f32.vlgmr.msra.gmra.mrb[0].mxu0 %vm234_vm2, %v1785_v27  ;;  %v1331_v45 = vpop.permute.xlu0 %1330  ;;  %1863 = vmatprep.mubr.msk.f32.mxu1 %vm2002_vm0, %v2001_v0  ;;  %v1494_v50 = vpop.permute.xlu1 %1493  ;;  %v1664_v27 = vrot.slane %v1659_v17, %v1663_v25 }
  0xb6   : > { %1024 = vmatpush1.msra.mxu0 %v1015_v43  ;;  %1087 = vmatprep.mubr.f32.mxu0 %v2001_v0  ;;  %v1337_v51 = vsel %vm1336_vm8, %v1331_v45, %v1333_v40 }
  0xb7   : > { %1184 = vmatprep.subr.mxu0 %v1177_v44 }
  0xb9   : > { %v1496_v47 = vpop.permute.xlu0 %1495  ;;  %v1492_v53 = vpop.permute.xlu1 %1491 }
  0xba   : > { %1862 = vmatpush3.msra.mxu1 %v1496_v47  ;;  %v1499_v52 = vsel %vm1497_vm9, %v1494_v50, %v1496_v47  ;;  %v1498_v54 = vsel %vm1497_vm9, %v1492_v53, %v1494_v50 }
  0xbb   : > { %1864 = vmatmul.mubr.msk.f32.vlgmr.msra.gmra.mrb[16].mxu1 %vm234_vm2, %v1797_v46 }
  0xbd   : > { %1789 = vmatmul.mubr.msk.f32.vlgmr.msra.gmra.mrb[0].mxu0 %vm234_vm2, %v1788_v32 }
  0xbe   : > { %1185 = vmatpush1.msra.mxu0 %v1176_v48  ;;  %1248 = vmatprep.mubr.f32.mxu0 %v2001_v0 }
  0xbf   : > { %1345 = vmatprep.subr.mxu0 %v1338_v49 }
  0xc5   : > { %1792 = vmatmul.mubr.msk.f32.vlgmr.msra.gmra.mrb[0].mxu0 %vm234_vm2, %v1791_v39 }
  0xc6   : > { %1346 = vmatpush1.msra.mxu0 %v1337_v51  ;;  %1409 = vmatprep.mubr.f32.mxu0 %v2001_v0 }
  0xc7   : > { %1506 = vmatprep.subr.mxu0 %v1499_v52 }
  0xca   : > { %v1654_v19 = vpop.permute.xlu0 %1653 }
  0xcd   : > { %1795 = vmatmul.mubr.msk.f32.vlgmr.msra.gmra.mrb[0].mxu0 %vm234_vm2, %v1794_v42 }
  0xce   : > { %1507 = vmatpush1.msra.mxu0 %v1498_v54  ;;  %1570 = vmatprep.mubr.f32.mxu0 %v2001_v0 }
  0xd5   : > { %1798 = vmatmul.mubr.msk.f32.vlgmr.msra.gmra.mrb[0].mxu0 %vm234_vm2, %v1797_v46 }
 0x166   : > { %v375_v55 = vpop.f32.mrb[0].mxu1 }
 0x167   : > { %v1825_v56 = vpop.f32.mrb[1].mxu1 }
 0x16b   : > { %v519_v57 = vpop.f32.mrb[2].mxu1 }
 0x16c   : > { %v520_v58 = vadd.f32 %v519_v57, %v375_v55  ;;  %v1830_v59 = vpop.f32.mrb[3].mxu1 }
 0x16f   : > { %v677_v60 = vpop.f32.mrb[4].mxu1 }
 0x170   : > { %v683_v61 = vadd.f32 %v677_v60, %v520_v58  ;;  %v1835_v62 = vpop.f32.mrb[5].mxu1 }
 0x173   : > { %v838_v63 = vpop.f32.mrb[6].mxu1 }
 0x174   : > { %v844_v1 = vadd.f32 %v838_v63, %v683_v61  ;;  %v1840_v2 = vpop.f32.mrb[7].mxu1 }
 0x177   : > { %v999_v3 = vpop.f32.mrb[8].mxu1 }
 0x178   : > { %v1005_v4 = vadd.f32 %v999_v3, %v844_v1  ;;  %v1845_v5 = vpop.f32.mrb[9].mxu1 }
 0x17b   : > { %v1160_v6 = vpop.f32.mrb[10].mxu1 }
 0x17c   : > { %v1166_v0 = vadd.f32 %v1160_v6, %v1005_v4  ;;  %v1850_v7 = vpop.f32.mrb[11].mxu1 }
 0x183   : > { %v1321_v8 = vpop.f32.mrb[12].mxu1 }
 0x184   : > { %v1327_v10 = vadd.f32 %v1321_v8, %v1166_v0  ;;  %v1855_v11 = vpop.f32.mrb[13].mxu1 }
 0x187   : > { %v1482_v12 = vpop.f32.mrb[14].mxu1 }
 0x188   : > { %v1488_v14 = vadd.f32 %v1482_v12, %v1327_v10  ;;  %v1860_v15 = vpop.f32.mrb[15].mxu1 }
 0x18e   : > { %v1643_v18 = vpop.f32.mrb[16].mxu1 }
 0x18f   : > { %v1649_v20 = vadd.f32 %v1643_v18, %v1488_v14  ;;  %v1865_v22 = vpop.f32.mrb[17].mxu1 }
 0x191   : > { %v1658_v23 = vadd.f32 %v1654_v19, %v1649_v20 }
 0x193   : > { %v1678_v24 = vmul.f32 %v1672_v21, %v1658_v23 }
 0x195   : > { %1682 = vst.msk [vmem:[%s203_s27 + $0x10] sm:$0xff] %vm1681_vm10, %v1678_v24 }
 0x1a8   : > { %v1572_v28 = vpop.f32.mrb[0].mxu0 }
 0x1a9   : > { %v1656_v30 = vadd.f32 %v1654_v19, %v1572_v28  ;;  %v1574_v31 = vpop.f32.mrb[1].mxu0 }
 0x1aa   : > { %v1657_v32 = vadd.f32 %v1654_v19, %v1574_v31 }
 0x1ab   : > { %v1676_v33 = vmul.f32 %v1664_v27, %v1656_v30 }
 0x1ac   : > { %v1677_v34 = vmul.f32 %v1668_v29, %v1657_v32 }
 0x1ad   : > { %1679 = vst [vmem:[%s203_s27] sm:$0xff] %v1676_v33 }
 0x1ae   : > { %1680 = vst [vmem:[%s203_s27 + $0x8] sm:$0xff] %v1677_v34 }
 0x1af   : > { %1950 = shalt.err (!%p1947_p3)
}
 0x1b0   : > { %s1951_s23 = scalar_lea.hbm %s2197_s12, 384  ;;  %s1955_s30 = scalar_lea.hbm %s2243_s4, 768 }
 0x1b1   : > { %p1952_p4 = scmp.ne.s32.totalorder %s2197_s12, %s1951_s23  ;;  %p1956_p9 = scmp.lt.u32.totalorder %s2197_s12, %s2243_s4 }
 0x1b2   : > { %p1957_p10 = scmp.lt.u32.totalorder %s1955_s30, %s1951_s23  ;;  %p1959_p12 = scmp.lt.u32.totalorder %s1951_s23, %s2197_s12 }
 0x1b3   : > { %p1953_p7 = pnand %p1952_p4, %p2076_p5 }
 0x1b4   : > { %p1958_p11 = por %p1957_p10, %p1956_p9 }
 0x1b5   : > { %p1954_p8 = pneg %p1953_p7 }
 0x1b6   : > { %p1960_p13 = por %p1959_p12, %p1958_p11 }
 0x1b8   : > { %p1961_p0 = pnand %p1960_p13, %p1954_p8 }
 0x1ba   : > { %1964 = shalt.err (!%p1961_p0)
}
 0x1bb   : > { %1886 = dma.vmem_to_hbm [thread:$0]  (%p2076_p5), %s2199_s9, 384, %s2197_s12, %s1684_s13  }
 0x1bc PF: > { %p1892_p1 = scmp.ge.s32.totalorder %s1999_s18, 2  ;;  %s1710_s7 = sand.u32 1, %s1987_s15  }
 0x1bd   : > { %s1711_s27 = scalar_lea.sflag [#allocation3], %s1710_s7 }
 0x1be   : > { %p1889_p2 = pnand %p1892_p1, %p2080_p6 }
 0x1c0   : > { %1982 = dma.done.wait (!%p1889_p2), %s1711_s27, 384  }
 0x1c1   : > { %1984 = vsyncadd (!%p1889_p2), %s1711_s27, 4294966912  ;;  %p14_p3 = scmp.ge.s32.totalorder %s2063_s21, 4   ;;  %s2246_s15 = smov %s1991_s16 }
 0x1c2   : > { %s2247_s16 = smov %s1995_s17  ;;  %s2248_s17 = smov %s2074_s24 }
 0x1c3   : > { %s2249_s18 = smov %s2063_s21  ;;  %16 = sbr.rel (!%p14_p3) target bundleno = 3 (0x3), region = 82 }
 0x1ca   :  { %1716 = vsyncpa [#allocation3], 1 }
 0x1cb   :  { %1718 = vsyncpa [#allocation3 + $0x1], 1 }

</bundles_post_ra>
